<compile_context>
chip_gen: v7x
topology: tpu7x:2x2x1
jax: 0.10.0
libtpu: 0.0.40
codegen_flags: <defaults>
</compile_context>

<pallas_src>
import functools

import jax
import jax.numpy as jnp
from jax import lax
from jax.experimental import pallas as pl
from jax.experimental.pallas import tpu as pltpu

_TARGET_TILE_BYTES = 4 * 1024 * 1024   # ~4 MiB tiles amortize the ~0.35 us/step overhead
_MAX_TILE_BYTES = 8 * 1024 * 1024      # hard cap; beyond this we pad & re-tile instead
_VMEM_LIMIT_CAP = 48 * 1024 * 1024     # stays inside v7x's 64 MiB physical VMEM


def _row_scale_kernel(scale_ref, x_ref, o_ref):
    # scale_ref : (TM, 1)  float32 per-row scale (0 or 1/(1-p))
    # x_ref     : (TM, FC) input tile
    # o_ref     : (TM, FC) output tile
    o_ref[...] = (x_ref[...] * scale_ref[...]).astype(o_ref.dtype)


def _const_scale_kernel(x_ref, o_ref, *, scale):
    # Whole-batch "keep" path: scale is a trace-time constant, no scale DMA.
    o_ref[...] = (x_ref[...] * jnp.float32(scale)).astype(o_ref.dtype)


def _choose_tile(n, f, itemsize, target_bytes):
    """Pick a (TM, FC) tile: lane/sublane dense, evenly dividing (n, f), ~target_bytes."""
    # Dtype-aware sublane packing: f32 -> 8 rows, bf16/f16 -> 16, int8/fp8 -> 32.
    sub = max(8, 32 // max(itemsize, 1))
    base = sub
    while base > 8 and n % base != 0:      # fall back to plain 8-row packing
        base //= 2
    row_div = (n % base == 0)

    # Feature chunk: largest multiple-of-128 divisor of f that keeps a base-row
    # tile within budget; full-dim escape hatch when f is not 128-aligned
    # (wrapper pads instead if that would produce an oversized tile).
    if f % 128 == 0:
        m = f // 128
        max_units = max(1, target_bytes // (128 * base * itemsize))
        fc = 128
        for cand in range(min(m, max_units), 0, -1):
            if m % cand == 0:
                fc = 128 * cand
                break
    else:
        fc = f

    # Row chunk: largest multiple-of-base divisor of n keeping the tile within
    # budget; full-dim escape hatch when n has no 8-aligned divisor.
    if row_div:
        tm = base
        max_rows = (target_bytes // max(fc * itemsize, 1)) // base * base
        start = min(n, max(max_rows, base)) // base * base
        for cand in range(start, base - 1, -base):
            if n % cand == 0:
                tm = cand
                break
    else:
        tm = n

    # v7x has two TensorCores: keep >=2 grid steps for non-tiny tensors so
    # dimension_semantics=("parallel","parallel") can actually shard work.
    if (n // tm) * (f // fc) == 1 and n * f * itemsize >= (2 << 20):
        if tm % 16 == 0:
            tm //= 2
        elif fc % 256 == 0:
            fc //= 2
    return tm, fc


def _pallas_scale(x2, scale_rows=None, const_scale=None):
    """out[i, :] = x2[i, :] * scale   (per-row scale array OR a constant scale)."""
    n, f = x2.shape
    itemsize = jnp.dtype(x2.dtype).itemsize
    sub = max(8, 32 // max(itemsize, 1))

    tm, fc = _choose_tile(n, f, itemsize, _TARGET_TILE_BYTES)

    padded = tm * fc * itemsize > _MAX_TILE_BYTES
    if padded:
        # Awkward shape (large N not 8-aligned and/or large F not 128-aligned):
        # pay a one-time pad copy so tiles stay dense and VMEM-bounded.
        n_p = -(-n // sub) * sub
        f_p = -(-f // 128) * 128
        x2 = jnp.pad(x2, ((0, n_p - n), (0, f_p - f)))
        if scale_rows is not None:
            scale_rows = jnp.pad(scale_rows, ((0, n_p - n), (0, 0)))
        tm, fc = _choose_tile(n_p, f_p, itemsize, _TARGET_TILE_BYTES)
        n_run, f_run = n_p, f_p
    else:
        n_run, f_run = n, f

    grid = (n_run // tm, f_run // fc)
    tile_bytes = tm * fc * itemsize
    # 2x input + 2x output tiles (double-buffered) + scale + compiler headroom.
    vmem_limit = min(_VMEM_LIMIT_CAP,
                     max(16 * 1024 * 1024, 4 * tile_bytes + (4 << 20)))
    compiler_params = pltpu.CompilerParams(
        dimension_semantics=("parallel", "parallel"),
        vmem_limit_bytes=int(vmem_limit))
    extra_bytes = n_run * 4 if scale_rows is not None else 0
    cost = pl.CostEstimate(
        flops=int(n_run * f_run),
        transcendentals=0,
        bytes_accessed=int(2 * n_run * f_run * itemsize + extra_bytes))

    out_shape = jax.ShapeDtypeStruct((n_run, f_run), x2.dtype)
    data_spec = pl.BlockSpec((tm, fc), lambda i, j: (i, j))

    if scale_rows is not None:
        out = pl.pallas_call(
            _row_scale_kernel,
            out_shape=out_shape,
            grid=grid,
            in_specs=[pl.BlockSpec((tm, 1), lambda i, j: (i, 0)), data_spec],
            out_specs=data_spec,
            compiler_params=compiler_params,
            cost_estimate=cost,
        )(scale_rows, x2)
    else:
        out = pl.pallas_call(
            functools.partial(_const_scale_kernel, scale=float(const_scale)),
            out_shape=out_shape,
            grid=grid,
            in_specs=[data_spec],
            out_specs=data_spec,
            compiler_params=compiler_params,
            cost_estimate=cost,
        )(x2)

    if padded:
        out = out[:n, :f]
    return out


def stochastic_depth(x, p, mode, training=True, *, key=None, seed=0):
    if p < 0.0 or p > 1.0:
        raise ValueError(f"drop probability has to be between 0 and 1, but got {p}")
    if mode not in ("batch", "row"):
        raise ValueError(f"mode has to be either 'batch' or 'row', but got {mode}")
    if (not training) or p == 0.0:
        return x

    survival_rate = 1.0 - p
    orig_shape = x.shape
    n = orig_shape[0]
    x2 = x.reshape(n, -1)

    if survival_rate == 0.0:            # p == 1.0: everything dropped (torchvision semantics)
        return jnp.zeros_like(x)

    # Pass a fresh jax.random key per call/layer for i.i.d. drops; `seed` is a
    # convenience fallback (deterministic per seed).
    if key is None:
        key = jax.random.PRNGKey(seed)
    inv_survival = 1.0 / survival_rate

    if mode == "batch":
        # One decision for the whole tensor: skip the input read entirely when
        # dropped, run a constant-scale kernel (no scale operand) when kept.
        keep = jax.random.bernoulli(key, survival_rate, ())
        out2 = lax.cond(
            keep,
            lambda xx: _pallas_scale(xx, const_scale=inv_survival),
            lambda xx: jnp.zeros_like(xx),
            x2)
    else:  # "row"
        keep = jax.random.bernoulli(key, survival_rate, (n,))
        scale = (keep.astype(jnp.float32) * jnp.float32(inv_survival)).reshape(n, 1)
        out2 = _pallas_scale(x2, scale_rows=scale)

    return out2.reshape(orig_shape)


class StochasticDepth:
    """Pallas-backed StochasticDepth (see torchvision.ops.stochastic_depth)."""

    def __init__(self, p: float, mode: str):
        self.p = p
        self.mode = mode
        self.training = True

    def __call__(self, x, key=None, seed=0):
        return stochastic_depth(x, self.p, self.mode, self.training, key=key, seed=seed)

    def __repr__(self):
        return f"{self.__class__.__name__}(p={self.p}, mode={self.mode})"


if __name__ == "__main__":
    root = jax.random.PRNGKey(0)
    kx, kbf = jax.random.split(root)
    x = jax.random.normal(kx, (2, 4, 16, 16), dtype=jnp.float32)

    p = 0.5
    sd_row = StochasticDepth(p=p, mode="row")
    sd_batch = StochasticDepth(p=p, mode="batch")

    y_row = jax.block_until_ready(sd_row(x, seed=0))
    y_batch = jax.block_until_ready(sd_batch(x, seed=1))

    # eval mode (training=False) -> identity
    sd_row.training = False
    y_eval = jax.block_until_ready(sd_row(x))
    sd_row.training = True

    assert y_row.shape == x.shape and y_row.dtype == x.dtype
    assert y_batch.shape == x.shape and y_batch.dtype == x.dtype
    assert jnp.allclose(y_eval, x)

    # Each row must be either all-zero or x_row / (1 - p).
    scale = 1.0 / (1.0 - p)
    for i in range(x.shape[0]):
        row = y_row[i]
        ok_zero = bool(jnp.allclose(row, 0.0))
        ok_scaled = bool(jnp.allclose(row, x[i] * scale, rtol=1e-5, atol=1e-5))
        assert ok_zero or ok_scaled

    # Batch mode: entire tensor either all-zero or x * scale.
    ok_zero = bool(jnp.allclose(y_batch, 0.0))
    ok_scaled = bool(jnp.allclose(y_batch, x * scale, rtol=1e-5, atol=1e-5))
    assert ok_zero or ok_scaled

    # bf16 input exercises the dtype-aware (16-row sublane) packing path.
    xb = jax.random.normal(kbf, (16, 4, 32), dtype=jnp.bfloat16)
    yb = jax.block_until_ready(stochastic_depth(xb, p, "row", training=True, seed=3))
    assert yb.shape == xb.shape and yb.dtype == xb.dtype
    for i in range(xb.shape[0]):
        row = yb[i].astype(jnp.float32)
        ref = xb[i].astype(jnp.float32) * scale
        assert bool(jnp.allclose(row, 0.0)) or bool(jnp.allclose(row, ref, rtol=2e-2, atol=2e-2))

    # p == 1.0 in training -> all zeros (matches torchvision).
    y_all_drop = jax.block_until_ready(
        stochastic_depth(x, 1.0, "row", training=True, seed=0))
    assert bool(jnp.allclose(y_all_drop, 0.0))

    print("KERNEL_OK")
</pallas_src>

<mosaic_0001>
module attributes {stable_mosaic.version = 11 : i64} {
  func.func @_row_scale_kernel(%arg0: i32, %arg1: i32, %arg2: memref<2x1xf32, #tpu.memory_space<vmem>>, %arg3: memref<2x1024xf32, #tpu.memory_space<vmem>>, %arg4: memref<2x1024xf32, #tpu.memory_space<vmem>>) attributes {dimension_semantics = [#tpu.dimension_semantics<parallel>, #tpu.dimension_semantics<parallel>], iteration_bounds = array<i64: 1, 1>, scalar_prefetch = 0 : i64, scratch_operands = 0 : i64, tpu.core_type = #tpu.core_type<tc>, window_params = [{transform_indices = @transform_0, window_bounds = array<i64: 2, 1>}, {transform_indices = @transform_1, window_bounds = array<i64: 2, 1024>}, {transform_indices = @transform_2, window_bounds = array<i64: 2, 1024>}]} {
    %c0 = arith.constant 0 : index
    %c0_0 = arith.constant 0 : index
    %0 = vector.load %arg3[%c0, %c0_0] : memref<2x1024xf32, #tpu.memory_space<vmem>>, vector<2x1024xf32>
    %c0_1 = arith.constant 0 : index
    %c0_2 = arith.constant 0 : index
    %1 = vector.load %arg2[%c0_1, %c0_2] : memref<2x1xf32, #tpu.memory_space<vmem>>, vector<2x1xf32>
    %2 = vector.broadcast %1 : vector<2x1xf32> to vector<2x1024xf32>
    %3 = arith.mulf %0, %2 : vector<2x1024xf32>
    %c0_3 = arith.constant 0 : index
    %c0_4 = arith.constant 0 : index
    %4 = vector.load %arg4[%c0_3, %c0_4] : memref<2x1024xf32, #tpu.memory_space<vmem>>, vector<2x1024xf32>
    tpu.vector_store %arg4[%c0_3, %c0_4], %3 {strides = array<i32>} : memref<2x1024xf32, #tpu.memory_space<vmem>>, vector<2x1024xf32>,
    return
  }
  func.func @transform_0(%arg0: i32, %arg1: i32) -> (i32, i32) {
    %c0_i32 = arith.constant 0 : i32
    %c0_i32_0 = arith.constant 0 : i32
    return %arg0, %c0_i32 : i32, i32
  }
  func.func @transform_1(%arg0: i32, %arg1: i32) -> (i32, i32) {
    %c0_i32 = arith.constant 0 : i32
    return %arg0, %arg1 : i32, i32
  }
  func.func @transform_2(%arg0: i32, %arg1: i32) -> (i32, i32) {
    %c0_i32 = arith.constant 0 : i32
    return %arg0, %arg1 : i32, i32
  }
}

</mosaic_0001>

<bundles_post_ra>
// kernel: tpu_custom_call.1
= control target key start
LH: loop header
LB: loop body
LE: loop exit
PB: predicated region body
PF: predicated region fallthrough
CT: control target
= control target key end

     0   :  { %7 = vsyncpa [#allocation3], 0  ;;  %s157_s0 = inlined_call_operand.vmem [shape: f32[2,1], index: 0, kind: input, shape index: {}]   ;;  %s158_s1 = inlined_call_operand.hbm [shape: f32[2,1024], index: 1, kind: input, shape index: {}]   ;;  %s159_s2 = inlined_call_operand.hbm [shape: f32[2,1024], index: 2, kind: output, shape index: {}]  }
   0x1   :  { %8 = vsyncpa [#allocation4], 0  ;;  %s111_s9 = smov [#allocation2]   ;;  %s63_s13 = scalar_lea.hbm %s158_s1, 256 }
   0x2   :  { %s17_s10 = sshll.u32 %s111_s9, 4  ;;  %p64_p0 = scmp.ne.s32.totalorder %s158_s1, %s63_s13  ;;  %s18_s10 = int_to_ptr.vmem [resolvable:$true] %s17_s10 }
   0x3   :  { %p67_p1 = scmp.lt.u32.totalorder %s63_s13, %s158_s1 }
   0x5   :  { %p69_p2 = pnand %p67_p1, %p64_p0 }
   0x7   :  { %72 = shalt.err (!%p69_p2)
}
   0x8   :  { %s73_s18 = scalar_lea.vmem %s18_s10, 256  ;;  %p78_p4 = scmp.lt.s32.totalorder %s18_s10, %s18_s10 }
   0x9   :  { %p74_p3 = scmp.ne.s32.totalorder %s18_s10, %s73_s18  ;;  %p79_p5 = scmp.lt.s32.totalorder %s73_s18, %s73_s18 }
   0xb   :  { %p80_p6 = por %p79_p5, %p78_p4 }
   0xd   :  { %p81_p7 = pnand %p80_p6, %p74_p3 }
   0xf   :  { %84 = shalt.err (!%p81_p7)
}
  0x10   :  { %20 = dma.hbm_to_vmem [thread:$0]  %s158_s1, 256, %s18_s10, [#allocation3]  }
  0x11   :  { %107 = dma.done.wait [#allocation3], 256  }
  0x12   :  { %108 = vsyncadd [#allocation3], 4294967040  ;;  %v112_v0 = vmov 0   ;;  %v26_v1 = vld [vmem:[%s157_s0] sm:$0x3]  ;;  %v34_v4 = vlaneseq  ;;  %v25_v10 = vld [vmem:[#allocation2 + $0x8] sm:$0xff] }
  0x13   :  { %62 = vset.pattern.permute.xlu0 %v112_v0  ;;  %v113_v2 = vmov 269488144   ;;  %v24_v9 = vld [vmem:[#allocation2] sm:$0xff]  ;;  %s114_s23 = smov [#allocation5]  }
  0x14   :  { %29 = vperm.xlu0 %62, %v26_v1   ;;  %v32_v3 = vunpack.c.l.s4 %v113_v2  ;;  %v35_v6 = vshrl.u32 %v34_v4, 7  ;;  %s49_s1 = sshll.u32 %s114_s23, 4  ;;  %s50_s1 = int_to_ptr.vmem [resolvable:$true] %s49_s1 }
  0x15   :  { %s85_s24 = scalar_lea.vmem %s50_s1, 256  ;;  %p90_p9 = scmp.lt.s32.totalorder %s50_s1, %s50_s1 }
  0x16   :  { %v33_v5 = vunpack.c.0.s8 %v32_v3  ;;  %p86_p8 = scmp.ne.s32.totalorder %s50_s1, %s85_s24  ;;  %p91_p10 = scmp.lt.s32.totalorder %s85_s24, %s85_s24 }
  0x18   :  { %v36_v7 = vsub.s32 %v33_v5, %v35_v6  ;;  %p92_p11 = por %p91_p10, %p90_p9 }
  0x1a   :  { %p93_p12 = pnand %p92_p11, %p86_p8 }
  0x93   :  { %v30_v8 = vpop.permute.xlu0 %29 }
  0x94   :  { %v37_v11 = vrot.slane %v30_v8, %v36_v7 }
  0x96   :  { %v39_v12 = vmul.f32 %v37_v11, %v24_v9  ;;  %v40_v13 = vmul.f32 %v37_v11, %v25_v10 }
  0x98   :  { %41 = vst [vmem:[#allocation5] sm:$0xff] %v39_v12  ;;  %42 = vst [vmem:[#allocation5 + $0x8] sm:$0xff] %v40_v13 }
  0x99   :  { %96 = shalt.err (!%p93_p12)
}
  0x9a   :  { %s97_s26 = scalar_lea.hbm %s159_s2, 256 }
  0x9b   :  { %p98_p13 = scmp.ne.s32.totalorder %s159_s2, %s97_s26  ;;  %p101_p0 = scmp.lt.u32.totalorder %s97_s26, %s159_s2 }
  0x9d   :  { %p103_p1 = pnand %p101_p0, %p98_p13 }
  0x9f   :  { %106 = shalt.err (!%p103_p1)
}
  0xa0   :  { %52 = dma.vmem_to_hbm [thread:$0]  %s50_s1, 256, %s159_s2, [#allocation4]  }
  0xa1   :  { %109 = dma.done.wait [#allocation4], 256  }
  0xa2   :  { %110 = vsyncadd [#allocation4], 4294967040 }
  0xa3   :  { %56 = vsyncpa [#allocation3], 1 }
  0xa4   :  { %57 = vsyncpa [#allocation4], 1 }

</bundles_post_ra>
